<compile_context>
chip_gen: v6e
topology: v6e:2x2x1
jax: 0.10.0
libtpu: 0.0.40
codegen_flags: <defaults>
</compile_context>

<pallas_src>
import functools

import numpy as np
import jax
import jax.numpy as jnp
from jax import lax
from jax.experimental import pallas as pl
from jax.experimental.pallas import tpu as pltpu


def _round_up(x, m):
    return (x + m - 1) // m * m


# ---------------------------------------------------------------------------
# VMEM / tile sizing helpers (host-side, static).
# ---------------------------------------------------------------------------
def _vmem_bytes_estimate(tile_m, H, node_feat_bytes):
    f = 4
    tiled_per_step = tile_m * (4 + 4 + H * f) + tile_m * H * f        # src,cnt,ef + out
    resident = (H * 2 * H + 2 * H + 2 * H * H + H) * f                # w1,b1,w2,b2
    dbl = 2 * (tiled_per_step + resident + node_feat_bytes)           # double-buffered
    scratch = tile_m * 2 * H * f                                      # h1 intermediate
    return dbl + scratch


def _pick_tile_m(U, H, *, node_feat_bytes, target_tile_bytes=1 << 20,
                 vmem_budget=40 << 20, min_steps=4):
    """Rows per grid step: ~1 MiB of agg, >=min_steps steps, within VMEM budget."""
    rows_by_bytes = max(8, (target_tile_bytes // (4 * H)) // 8 * 8)
    rows_for_steps = max(8, _round_up(pl.cdiv(U, min_steps), 8))
    tile_m = min(rows_by_bytes, rows_for_steps, _round_up(U, 8))
    while tile_m > 8 and _vmem_bytes_estimate(tile_m, H, node_feat_bytes) > vmem_budget:
        tile_m = max(8, (tile_m // 2) // 8 * 8)
    return tile_m


# ---------------------------------------------------------------------------
# Pallas kernels.
# ---------------------------------------------------------------------------
def gin_fused_kernel(src_ref, cnt_ref, ef_ref, nf_ref,
                     w1_ref, b1_ref, w2_ref, b2_ref, out_ref):
    """Fused gather + message add + count scale + 2-layer MLP on one (TM, H) row tile."""
    nf = nf_ref[...]                                           # (N, H) VMEM-resident
    idx = src_ref[...]                                         # (TM, 1) int32
    tm, n = idx.shape[0], nf.shape[0]
    # Gather node_feat[src] on the MXU via a one-hot matmul (exact for 0/1 weights).
    onehot = (lax.broadcasted_iota(jnp.int32, (tm, n), 1) == idx).astype(nf.dtype)
    gathered = jnp.dot(onehot, nf, preferred_element_type=jnp.float32)   # (TM, H)
    agg = cnt_ref[...] * (gathered + ef_ref[...])                        # (TM, H)
    h1 = jnp.dot(agg, w1_ref[...], preferred_element_type=jnp.float32) + b1_ref[...]
    h1 = jnp.maximum(h1, 0.0)
    out = jnp.dot(h1, w2_ref[...], preferred_element_type=jnp.float32) + b2_ref[...]
    out_ref[...] = out.astype(out_ref.dtype)


def gin_mlp_kernel(agg_ref, w1_ref, b1_ref, w2_ref, b2_ref, out_ref):
    """MLP-only kernel (fallback path when node_feat does not fit VMEM)."""
    h1 = jnp.dot(agg_ref[...], w1_ref[...],
                 preferred_element_type=jnp.float32) + b1_ref[...]
    h1 = jnp.maximum(h1, 0.0)
    out = jnp.dot(h1, w2_ref[...], preferred_element_type=jnp.float32) + b2_ref[...]
    out_ref[...] = out.astype(out_ref.dtype)


# ---------------------------------------------------------------------------
# Jitted device-side forwards.
# ---------------------------------------------------------------------------
@functools.partial(jax.jit, static_argnames=("tile_m", "vmem_limit"))
def _gin_fused_device(src_u2d, counts2d, edge_feat, node_feat,
                      w1, b1_2d, w2, b2_2d, *, tile_m, vmem_limit):
    U = src_u2d.shape[0]
    N, H = node_feat.shape
    grid = (pl.cdiv(U, tile_m),)

    flops = 2 * U * N * H + 8 * U * H * H
    bytes_accessed = (U * (4 + 4 + 4 * H + 4 * H) + N * H * 4
                      + (H * 2 * H + 2 * H + 2 * H * H + H) * 4)

    return pl.pallas_call(
        gin_fused_kernel,
        out_shape=jax.ShapeDtypeStruct((U, H), node_feat.dtype),
        grid_spec=pltpu.PrefetchScalarGridSpec(
            num_scalar_prefetch=0,
            grid=grid,
            in_specs=[
                pl.BlockSpec((tile_m, 1), lambda i: (i, 0)),   # src ids (row tile)
                pl.BlockSpec((tile_m, 1), lambda i: (i, 0)),   # counts  (row tile)
                pl.BlockSpec((tile_m, H), lambda i: (i, 0)),   # edge_feat rows
                pl.BlockSpec((N, H), lambda i: (0, 0)),        # node_feat: VMEM-resident
                pl.BlockSpec(w1.shape, lambda i: (0, 0)),      # weights/biases resident
                pl.BlockSpec(b1_2d.shape, lambda i: (0, 0)),
                pl.BlockSpec(w2.shape, lambda i: (0, 0)),
                pl.BlockSpec(b2_2d.shape, lambda i: (0, 0)),
            ],
            out_specs=pl.BlockSpec((tile_m, H), lambda i: (i, 0)),
        ),
        compiler_params=pltpu.CompilerParams(
            dimension_semantics=("parallel",),                 # megacore sharding on v7x
            vmem_limit_bytes=vmem_limit,
        ),
        cost_estimate=pl.CostEstimate(flops=int(flops), transcendentals=0,
                                      bytes_accessed=int(bytes_accessed)),
    )(src_u2d, counts2d, edge_feat, node_feat, w1, b1_2d, w2, b2_2d)


@functools.partial(jax.jit, static_argnames=("tile_m", "vmem_limit"))
def _gin_mlp_device(node_feat, edge_feat, src_u, counts,
                    w1, b1_2d, w2, b2_2d, *, tile_m, vmem_limit):
    U = counts.shape[0]
    H = node_feat.shape[1]
    # Fallback: XLA-side fused gather + message add + count scale.
    agg = counts[:, None] * (jnp.take(node_feat, src_u, axis=0) + edge_feat[:U])
    grid = (pl.cdiv(U, tile_m),)
    flops = 8 * U * H * H
    bytes_accessed = U * 8 * H + (H * 2 * H + 2 * H + 2 * H * H + H) * 4

    return pl.pallas_call(
        gin_mlp_kernel,
        out_shape=jax.ShapeDtypeStruct((U, H), node_feat.dtype),
        grid_spec=pltpu.PrefetchScalarGridSpec(
            num_scalar_prefetch=0,
            grid=grid,
            in_specs=[
                pl.BlockSpec((tile_m, H), lambda i: (i, 0)),
                pl.BlockSpec(w1.shape, lambda i: (0, 0)),
                pl.BlockSpec(b1_2d.shape, lambda i: (0, 0)),
                pl.BlockSpec(w2.shape, lambda i: (0, 0)),
                pl.BlockSpec(b2_2d.shape, lambda i: (0, 0)),
            ],
            out_specs=pl.BlockSpec((tile_m, H), lambda i: (i, 0)),
        ),
        compiler_params=pltpu.CompilerParams(
            dimension_semantics=("parallel",),
            vmem_limit_bytes=vmem_limit,
        ),
        cost_estimate=pl.CostEstimate(flops=int(flops), transcendentals=0,
                                      bytes_accessed=int(bytes_accessed)),
    )(agg, w1, b1_2d, w2, b2_2d)


# ---------------------------------------------------------------------------
# Host-side graph preprocessing (static graph -> cache across calls).
# ---------------------------------------------------------------------------
def preprocess_graph(src, dst):
    src_np = np.asarray(src)
    dst_np = np.asarray(dst)
    uniq, seg = np.unique(dst_np, return_inverse=True)          # sorted, like torch.unique
    U = int(uniq.shape[0])
    assert src_np.shape[0] >= U, "need E >= U (U = #unique destinations)"
    counts = np.bincount(seg, minlength=U).astype(np.float32)   # (U,)
    # Reference quirk: only the first U edge messages are ever read.
    src_u = src_np[:U].astype(np.int32)
    return U, src_u, counts


def gin_forward(node_feat, edge_feat, src, dst, w1, b1, w2, b2, *,
                node_vmem_budget_bytes=16 << 20, target_tile_bytes=1 << 20):
    """node_feat: (N, H) f32, edge_feat: (E, H) f32, src/dst: (E,) int.
    Weights stored pre-transposed as (in, out) so y = x @ W + b matches nn.Linear."""
    U, src_u, counts = preprocess_graph(src, dst)
    N, H = node_feat.shape
    if U == 0:
        return jnp.zeros((0, H), dtype=node_feat.dtype)

    node_bytes = N * H * 4
    fused = node_bytes <= node_vmem_budget_bytes
    tile_m = _pick_tile_m(U, H, node_feat_bytes=node_bytes if fused else 0,
                          target_tile_bytes=target_tile_bytes)
    vmem_need = _vmem_bytes_estimate(tile_m, H, node_bytes if fused else 0)
    vmem_limit = int(min(48 << 20, max(32 << 20, 2 * vmem_need)))

    b1_2d = b1.reshape(1, -1)                  # (1, 2H)
    b2_2d = b2.reshape(1, -1)                  # (1, H)

    if fused:
        return _gin_fused_device(
            jnp.asarray(src_u).reshape(-1, 1), jnp.asarray(counts).reshape(-1, 1),
            edge_feat, node_feat, w1, b1_2d, w2, b2_2d,
            tile_m=tile_m, vmem_limit=vmem_limit)

    return _gin_mlp_device(node_feat, edge_feat, jnp.asarray(src_u), jnp.asarray(counts),
                           w1, b1_2d, w2, b2_2d, tile_m=tile_m, vmem_limit=vmem_limit)


# ---------------------------------------------------------------------------
# Pure-numpy reference (mirrors the PyTorch module, including the recv quirk).
# ---------------------------------------------------------------------------
def ref_forward_numpy(node_feat, edge_feat, src, dst, w1, b1, w2, b2):
    node_feat = np.asarray(node_feat)
    edge_feat = np.asarray(edge_feat)
    uniq, seg = np.unique(np.asarray(dst), return_inverse=True)
    U = uniq.shape[0]
    counts = np.bincount(seg, minlength=U).astype(np.float32)
    msg = node_feat[np.asarray(src)] + edge_feat                 # (E, H)
    out = counts[:, None] * msg[:U]                              # (U, H)
    h1 = np.maximum(out @ np.asarray(w1) + np.asarray(b1), 0.0)
    return h1 @ np.asarray(w2) + np.asarray(b2)


if __name__ == "__main__":
    H = 32           # hidden_size
    N = 16           # num_nodes
    E = 48           # num_edges

    key = jax.random.PRNGKey(0)
    k_nf, k_ef, k_src, k_dst, k_w1, k_b1, k_w2, k_b2 = jax.random.split(key, 8)

    node_feat = jax.random.normal(k_nf, (N, H), dtype=jnp.float32)
    edge_feat = jax.random.normal(k_ef, (E, H), dtype=jnp.float32)
    src = jax.random.randint(k_src, (E,), 0, N, dtype=jnp.int32)
    dst = jax.random.randint(k_dst, (E,), 0, N, dtype=jnp.int32)

    # nn.Linear(H, 2H) and nn.Linear(2H, H) params, stored transposed (in, out).
    w1 = jax.random.normal(k_w1, (H, 2 * H), dtype=jnp.float32) * 0.1
    b1 = jax.random.normal(k_b1, (2 * H,), dtype=jnp.float32) * 0.1
    w2 = jax.random.normal(k_w2, (2 * H, H), dtype=jnp.float32) * 0.1
    b2 = jax.random.normal(k_b2, (H,), dtype=jnp.float32) * 0.1

    ref = ref_forward_numpy(node_feat, edge_feat, src, dst, w1, b1, w2, b2)

    # Fused path (in-kernel gather, node_feat VMEM-resident, >=2 grid steps).
    out = gin_forward(node_feat, edge_feat, src, dst, w1, b1, w2, b2)
    out = jax.block_until_ready(out)
    np.testing.assert_allclose(np.asarray(out), ref, rtol=1e-4, atol=1e-4)

    # Fallback path (forced): XLA gather feeding the MLP-only kernel.
    out_fb = gin_forward(node_feat, edge_feat, src, dst, w1, b1, w2, b2,
                         node_vmem_budget_bytes=0)
    out_fb = jax.block_until_ready(out_fb)
    np.testing.assert_allclose(np.asarray(out_fb), ref, rtol=1e-4, atol=1e-4)

    print("KERNEL_OK")
</pallas_src>

<mosaic_0001>
module attributes {stable_mosaic.version = 11 : i64} {
  func.func @gin_fused_kernel(%arg0: i32, %arg1: memref<8x1xi32, #tpu.memory_space<vmem>>, %arg2: memref<8x1xf32, #tpu.memory_space<vmem>>, %arg3: memref<8x32xf32, #tpu.memory_space<vmem>>, %arg4: memref<16x32xf32, #tpu.memory_space<vmem>>, %arg5: memref<32x64xf32, #tpu.memory_space<vmem>>, %arg6: memref<1x64xf32, #tpu.memory_space<vmem>>, %arg7: memref<64x32xf32, #tpu.memory_space<vmem>>, %arg8: memref<1x32xf32, #tpu.memory_space<vmem>>, %arg9: memref<8x32xf32, #tpu.memory_space<vmem>>) attributes {dimension_semantics = [#tpu.dimension_semantics<parallel>], iteration_bounds = array<i64: 2>, scalar_prefetch = 0 : i64, scratch_operands = 0 : i64, tpu.core_type = #tpu.core_type<tc>, window_params = [{transform_indices = @transform_0, window_bounds = array<i64: 8, 1>}, {transform_indices = @transform_1, window_bounds = array<i64: 8, 1>}, {transform_indices = @transform_2, window_bounds = array<i64: 8, 32>}, {pipeline_mode = #tpu.pipeline_mode<synchronous>, transform_indices = @transform_3, window_bounds = array<i64: 16, 32>}, {pipeline_mode = #tpu.pipeline_mode<synchronous>, transform_indices = @transform_4, window_bounds = array<i64: 32, 64>}, {pipeline_mode = #tpu.pipeline_mode<synchronous>, transform_indices = @transform_5, window_bounds = array<i64: 1, 64>}, {pipeline_mode = #tpu.pipeline_mode<synchronous>, transform_indices = @transform_6, window_bounds = array<i64: 64, 32>}, {pipeline_mode = #tpu.pipeline_mode<synchronous>, transform_indices = @transform_7, window_bounds = array<i64: 1, 32>}, {transform_indices = @transform_8, window_bounds = array<i64: 8, 32>}]} {
    %c0 = arith.constant 0 : index
    %c0_0 = arith.constant 0 : index
    %0 = vector.load %arg4[%c0, %c0_0] : memref<16x32xf32, #tpu.memory_space<vmem>>, vector<16x32xf32>
    %c0_1 = arith.constant 0 : index
    %c0_2 = arith.constant 0 : index
    %1 = vector.load %arg1[%c0_1, %c0_2] : memref<8x1xi32, #tpu.memory_space<vmem>>, vector<8x1xi32>
    %2 = tpu.iota {dimensions = array<i32: 1>} : vector<8x16xi32>
    %3 = vector.broadcast %1 : vector<8x1xi32> to vector<8x16xi32>
    %4 = arith.cmpi eq, %2, %3 : vector<8x16xi32>
    %5 = arith.extui %4 : vector<8x16xi1> to vector<8x16xi32>
    %6 = arith.sitofp %5 : vector<8x16xi32> to vector<8x16xf32>
    %cst = arith.constant dense<0.000000e+00> : vector<8x32xf32>
    %7 = tpu.matmul %6, %0, %cst {dimension_numbers = #tpu.dot_dimension_numbers<[1], [0], [0], [1], [0, 0, 1, 1], [], []>} : vector<8x16xf32>, vector<16x32xf32>, vector<8x32xf32> -> vector<8x32xf32>
    %c0_3 = arith.constant 0 : index
    %c0_4 = arith.constant 0 : index
    %8 = vector.load %arg2[%c0_3, %c0_4] : memref<8x1xf32, #tpu.memory_space<vmem>>, vector<8x1xf32>
    %c0_5 = arith.constant 0 : index
    %c0_6 = arith.constant 0 : index
    %9 = vector.load %arg3[%c0_5, %c0_6] : memref<8x32xf32, #tpu.memory_space<vmem>>, vector<8x32xf32>
    %10 = arith.addf %7, %9 : vector<8x32xf32>
    %11 = vector.broadcast %8 : vector<8x1xf32> to vector<8x32xf32>
    %12 = arith.mulf %11, %10 : vector<8x32xf32>
    %c0_7 = arith.constant 0 : index
    %c0_8 = arith.constant 0 : index
    %13 = vector.load %arg5[%c0_7, %c0_8] : memref<32x64xf32, #tpu.memory_space<vmem>>, vector<32x64xf32>
    %cst_9 = arith.constant dense<0.000000e+00> : vector<8x64xf32>
    %14 = tpu.matmul %12, %13, %cst_9 {dimension_numbers = #tpu.dot_dimension_numbers<[1], [0], [0], [1], [0, 0, 1, 1], [], []>} : vector<8x32xf32>, vector<32x64xf32>, vector<8x64xf32> -> vector<8x64xf32>
    %c0_10 = arith.constant 0 : index
    %c0_11 = arith.constant 0 : index
    %15 = vector.load %arg6[%c0_10, %c0_11] : memref<1x64xf32, #tpu.memory_space<vmem>>, vector<1x64xf32>
    %16 = vector.broadcast %15 : vector<1x64xf32> to vector<8x64xf32>
    %17 = arith.addf %14, %16 : vector<8x64xf32>
    %cst_12 = arith.constant 0.000000e+00 : f32
    %18 = vector.broadcast %cst_12 : f32 to vector<8x64xf32>
    %19 = arith.maximumf %17, %18 : vector<8x64xf32>
    %c0_13 = arith.constant 0 : index
    %c0_14 = arith.constant 0 : index
    %20 = vector.load %arg7[%c0_13, %c0_14] : memref<64x32xf32, #tpu.memory_space<vmem>>, vector<64x32xf32>
    %cst_15 = arith.constant dense<0.000000e+00> : vector<8x32xf32>
    %21 = tpu.matmul %19, %20, %cst_15 {dimension_numbers = #tpu.dot_dimension_numbers<[1], [0], [0], [1], [0, 0, 1, 1], [], []>} : vector<8x64xf32>, vector<64x32xf32>, vector<8x32xf32> -> vector<8x32xf32>
    %c0_16 = arith.constant 0 : index
    %c0_17 = arith.constant 0 : index
    %22 = vector.load %arg8[%c0_16, %c0_17] : memref<1x32xf32, #tpu.memory_space<vmem>>, vector<1x32xf32>
    %23 = vector.broadcast %22 : vector<1x32xf32> to vector<8x32xf32>
    %24 = arith.addf %21, %23 : vector<8x32xf32>
    %c0_18 = arith.constant 0 : index
    %c0_19 = arith.constant 0 : index
    %25 = vector.load %arg9[%c0_18, %c0_19] : memref<8x32xf32, #tpu.memory_space<vmem>>, vector<8x32xf32>
    tpu.vector_store %arg9[%c0_18, %c0_19], %24 {strides = array<i32>} : memref<8x32xf32, #tpu.memory_space<vmem>>, vector<8x32xf32>,
    return
  }
  func.func @transform_0(%arg0: i32) -> (i32, i32) {
    %c0_i32 = arith.constant 0 : i32
    %c0_i32_0 = arith.constant 0 : i32
    return %arg0, %c0_i32 : i32, i32
  }
  func.func @transform_1(%arg0: i32) -> (i32, i32) {
    %c0_i32 = arith.constant 0 : i32
    %c0_i32_0 = arith.constant 0 : i32
    return %arg0, %c0_i32 : i32, i32
  }
  func.func @transform_2(%arg0: i32) -> (i32, i32) {
    %c0_i32 = arith.constant 0 : i32
    %c0_i32_0 = arith.constant 0 : i32
    return %arg0, %c0_i32 : i32, i32
  }
  func.func @transform_3(%arg0: i32) -> (i32, i32) {
    %c0_i32 = arith.constant 0 : i32
    %c0_i32_0 = arith.constant 0 : i32
    %c0_i32_1 = arith.constant 0 : i32
    return %c0_i32, %c0_i32_0 : i32, i32
  }
  func.func @transform_4(%arg0: i32) -> (i32, i32) {
    %c0_i32 = arith.constant 0 : i32
    %c0_i32_0 = arith.constant 0 : i32
    %c0_i32_1 = arith.constant 0 : i32
    return %c0_i32, %c0_i32_0 : i32, i32
  }
  func.func @transform_5(%arg0: i32) -> (i32, i32) {
    %c0_i32 = arith.constant 0 : i32
    %c0_i32_0 = arith.constant 0 : i32
    %c0_i32_1 = arith.constant 0 : i32
    return %c0_i32, %c0_i32_0 : i32, i32
  }
  func.func @transform_6(%arg0: i32) -> (i32, i32) {
    %c0_i32 = arith.constant 0 : i32
    %c0_i32_0 = arith.constant 0 : i32
    %c0_i32_1 = arith.constant 0 : i32
    return %c0_i32, %c0_i32_0 : i32, i32
  }
  func.func @transform_7(%arg0: i32) -> (i32, i32) {
    %c0_i32 = arith.constant 0 : i32
    %c0_i32_0 = arith.constant 0 : i32
    %c0_i32_1 = arith.constant 0 : i32
    return %c0_i32, %c0_i32_0 : i32, i32
  }
  func.func @transform_8(%arg0: i32) -> (i32, i32) {
    %c0_i32 = arith.constant 0 : i32
    %c0_i32_0 = arith.constant 0 : i32
    return %arg0, %c0_i32 : i32, i32
  }
}

</mosaic_0001>

<bundles_post_ra>
// kernel: _gin_fused_device.1
= control target key start
LH: loop header
LB: loop body
LE: loop exit
PB: predicated region body
PF: predicated region fallthrough
CT: control target
= control target key end

     0   :  { %13 = vsyncpa [#allocation3], 0  ;;  %s1099_s0 = inlined_call_operand.vmem [shape: s32[15,1], index: 0, kind: input, shape index: {}]   ;;  %s1100_s1 = inlined_call_operand.vmem [shape: f32[15,1], index: 1, kind: input, shape index: {}]   ;;  %s1101_s2 = inlined_call_operand.vmem [shape: f32[48,32], index: 2, kind: input, shape index: {}]   ;;  %s1102_s3 = inlined_call_operand.vmem [shape: f32[16,32], index: 3, kind: input, shape index: {}]   ;;  %s1103_s4 = inlined_call_operand.vmem [shape: f32[32,64], index: 4, kind: input, shape index: {}]   ;;  %s1104_s5 = inlined_call_operand.vmem [shape: f32[1,64], index: 5, kind: input, shape index: {}]   ;;  %s1105_s6 = inlined_call_operand.vmem [shape: f32[64,32], index: 6, kind: input, shape index: {}]   ;;  %s1106_s7 = inlined_call_operand.vmem [shape: f32[1,32], index: 7, kind: input, shape index: {}]   ;;  %s1107_s8 = inlined_call_operand.hbm [shape: f32[15,32], index: 8, kind: output, shape index: {}]  }
   0x1   :  { %15 = vsyncpa [#allocation3 + $0x1], 0  ;;  %s927_s27 = smov 0   ;;  %s929_s28 = smov 0  }
   0x2   :  { %s931_s29 = smov 0   ;;  %s933_s30 = smov 0  }
   0x3 LB: > { %s948_s9 = sadd.s32 4294967295, %s876_s30   ;;  %s701_s10 = sadd.s32 4294967294, %s876_s30   ;;  %s876_s30 = sphi %s933_s30, %s1113_s30   ;;  %s872_s29 = sphi %s931_s29, %s1112_s29   ;;  %s868_s28 = sphi %s929_s28, %s1111_s28   ;;  %s864_s27 = sphi %s927_s27, %s1110_s27  }
   0x4   : > { %s952_s11 = sadd.s32 1, %s876_s30   ;;  %s211_s12 = sadd.s32 1, %s872_s29 }
   0x5   : > { %s208_s13 = ssub.s32 %s876_s30, %s952_s11  ;;  %p221_p0 = scmp.ne.s32.totalorder %s872_s29, %s868_s28 }
   0x6   : > { %p209_p1 = scmp.eq.s32.totalorder %s208_s13, 0  ;;  %p222_p2 = scmp.eq.s32.totalorder %s948_s9, 1 }
   0x7   : > { %p227_p3 = scmp.ne.s32.totalorder %s868_s28, %s864_s27  ;;  %p228_p4 = scmp.eq.s32.totalorder %s701_s10, 1 }
   0x8   : > { %s963_s14 = scalar_select %p209_p1, %s872_s29, %s211_s12  }
   0x9   : > { %p965_p5 = por %p222_p2, %p221_p0  ;;  %p969_p6 = por %p228_p4, %p227_p3 }
   0xa   : > { %p704_p7 = scmp.ge.s32.totalorder %s876_s30, 1  ;;  %p282_p8 = scmp.lt.s32.totalorder %s876_s30, 3 }
   0xc   : > { %p283_p9 = pnand %p704_p7, %p282_p8 }
   0xd   : > { %p323_p10 = scmp.lt.s32.totalorder (!%p283_p9), %s948_s9, 1  ;;  %p331_p11 = scmp.lt.s32.totalorder (!%p283_p9), %s948_s9, 5 }
   0xe   : > { %286 = sbr.rel (%p283_p9) target bundleno = 752 (0x2f0), region = 52 }
  0x13   : > { %v336_v0 = vld [vmem:[%s1102_s3 + $0x8] sm:$0xff]  ;;  %v878_v1 = vmov 0   ;;  %v879_v2 = vmov 0.0   ;;  %s324_s19 = scalar_select %p323_p10, %s948_s9, 1  ;;  %v335_v3 = vld [vmem:[%s1102_s3] sm:$0xff]  ;;  %vm880_vm0 = vmmov 0   ;;  %v338_v6 = vlaneseq }
  0x14   : > { %815 = vset.pattern.permute.xlu0 %v878_v1  ;;  %736 = vmatprep.subr.mxu1 %v879_v2  ;;  %vm348_vm1 = vcmask 130048   ;;  %v431_v9 = vld [vmem:[%s1103_s4 + $0x18] sm:$0xff]  ;;  %v430_v11 = vld [vmem:[%s1103_s4 + $0x10] sm:$0xff]  ;;  %v429_v12 = vld [vmem:[%s1103_s4 + $0x8] sm:$0xff]  ;;  %s332_s21 = scalar_select %p331_p11, %s948_s9, 5  ;;  %vm439_vm3 = vcmask 261120  }
  0x15   : > { %737 = vmatpush3.msra.mxu1 %v336_v0  ;;  %754 = vmatprep.subr.mxu0 %v879_v2  ;;  %s706_s22 = sshll.u32 %s324_s19, 3  ;;  %v339_v7 = vand.u32 127, %v338_v6  ;;  %v428_v13 = vld [vmem:[%s1103_s4] sm:$0xff]  ;;  %v521_v14 = vld [vmem:[%s1105_s6 + $0x38] sm:$0xff]  ;;  %v520_v15 = vld [vmem:[%s1105_s6 + $0x30] sm:$0xff]  ;;  %vm529_vm4 = vcmask 523264  }
  0x16   : > { %738 = vmatprep.subr.mxu1 %v879_v2  ;;  %740 = vmatprep.mubr.msk.f32.mxu1 %vm880_vm0, %v879_v2  ;;  %s326_s25 = scalar_lea.vmem %s1099_s0, %s706_s22  ;;  %s330_s12 = scalar_lea.vmem %s1100_s1, %s706_s22  ;;  %v519_v16 = vld [vmem:[%s1105_s6 + $0x28] sm:$0xff]  ;;  %v518_v17 = vld [vmem:[%s1105_s6 + $0x20] sm:$0xff]  ;;  %v517_v18 = vld [vmem:[%s1105_s6 + $0x18] sm:$0xff] }
  0x17   : > { %739 = vmatpush3.msra.mxu1 %v335_v3  ;;  %770 = vmatprep.mubr.msk.f32.mxu0 %vm880_vm0, %v879_v2  ;;  %v337_v4 = vld [vmem:[%s326_s25] sm:$0xff]  ;;  %s708_s22 = sshll.u32 %s332_s21, 3  ;;  %v516_v25 = vld [vmem:[%s1105_s6 + $0x10] sm:$0xff]  ;;  %v515_v26 = vld [vmem:[%s1105_s6 + $0x8] sm:$0xff]  ;;  %s320_s21 = sand.u32 1, %s868_s28  }
  0x18   : > { %743 = vmatprep.subr.mxu1 %v879_v2  ;;  %341 = vperm.xlu0 %815, %v337_v4   ;;  %v346_v5 = vld [vmem:[%s330_s12] sm:$0xff]  ;;  %s334_s25 = scalar_lea.vmem %s1101_s2, %s708_s22  ;;  %s705_s22 = sshll.u32 %s320_s21, 3 }
  0x19   : > { %755 = vmatpush3.msra.mxu0 %v521_v14  ;;  %v347_v19 = vld [vmem:[%s334_s25] sm:$0xff]  ;;  %s716_s25 = sshll.u32 %s948_s9, 7  ;;  %s322_s26 = scalar_lea.vmem [#allocation2], %s705_s22 }
  0x1a   : > { %756 = vmatprep.subr.mxu0 %v879_v2  ;;  %v514_v27 = vld [vmem:[%s1105_s6] sm:$0xff]  ;;  %s618_s10 = sshll.u32 %s322_s26, 4  ;;  %s1063_s17 = scalar_lea.hbm %s1107_s8, %s716_s25  ;;  %s619_s10 = int_to_ptr.vmem [resolvable:$true] %s618_s10 }
  0x1b   : > { %757 = vmatpush3.msra.mxu0 %v520_v15  ;;  %v711_v28 = vld [vmem:[%s1104_s5] ss:$0 sm:$0xff]  ;;  %s605_s18 = scalar_lea.sflag [#allocation3], %s320_s21  ;;  %s816_s19 = scalar_lea.vmem %s619_s10, 128 }
  0x1c   : > { %424 = vperm.xlu0 %815, %v346_v5   ;;  %758 = vmatprep.subr.mxu0 %v879_v2  ;;  %v713_v33 = vld [vmem:[%s1106_s7] ss:$0 sm:$0xff]  ;;  %p817_p12 = scmp.ne.s32.totalorder %s619_s10, %s816_s19  ;;  %s881_s9 = smov [#allocation2]  }
  0x1d   : > { %759 = vmatpush3.msra.mxu0 %v519_v16  ;;  %s820_s20 = sshll.u32 %s881_s9, 4  ;;  %s821_s20 = int_to_ptr.vmem [resolvable:$false] %s820_s20 }
  0x1e   : > { %760 = vmatprep.subr.mxu0 %v879_v2  ;;  %p818_p13 = pnand %p817_p12, %p965_p5  ;;  %s822_s22 = scalar_lea.vmem %s821_s20, 256 }
  0x1f   : > { %761 = vmatpush3.msra.mxu0 %v518_v17  ;;  %p823_p1 = scmp.lt.s32.totalorder %s619_s10, %s821_s20  ;;  %p824_p2 = scmp.lt.s32.totalorder %s822_s22, %s816_s19 }
  0x20   : > { %762 = vmatprep.subr.mxu0 %v879_v2  ;;  %p819_p0 = pneg %p818_p13 }
  0x21   : > { %763 = vmatpush3.msra.mxu0 %v517_v18  ;;  %p825_p3 = por %p824_p2, %p823_p1 }
  0x22   : > { %764 = vmatprep.subr.mxu0 %v879_v2 }
  0x23   : > { %765 = vmatpush3.msra.mxu0 %v516_v25  ;;  %p826_p4 = pnand %p825_p3, %p819_p0 }
  0x24   : > { %766 = vmatprep.subr.mxu0 %v879_v2 }
  0x25   : > { %767 = vmatpush3.msra.mxu0 %v515_v26 }
  0x26   : > { %768 = vmatprep.subr.mxu0 %v879_v2 }
  0x27   : > { %769 = vmatpush3.msra.mxu0 %v514_v27 }
  0x93   : > { %v342_v8 = vpop.permute.xlu0 %341 }
  0x94   : > { %vm343_vm2 = vcmp.eq.s32.totalorder %v339_v7, %v342_v8 }
  0x95   : > { %v709_v10 = vsel %vm343_vm2, 1.0, %v879_v2 }
  0x96   : > { %741 = vmatmul.mubr.msk.f32.vlgmr.msra.gmra.mxu1 %vm348_vm1, %v709_v10 }
  0x97   : > { %744 = vmatpush3.msra.mxu1 %v431_v9  ;;  %751 = vmatprep.mubr.msk.f32.mxu1 %vm880_vm0, %v879_v2  ;;  %v425_v22 = vpop.permute.xlu0 %424 }
  0x98   : > { %745 = vmatprep.subr.mxu1 %v879_v2 }
  0x99   : > { %746 = vmatpush3.msra.mxu1 %v430_v11 }
  0x9a   : > { %747 = vmatprep.subr.mxu1 %v879_v2 }
  0x9b   : > { %748 = vmatpush3.msra.mxu1 %v429_v12 }
  0x9c   : > { %749 = vmatprep.subr.mxu1 %v879_v2 }
  0x9d   : > { %750 = vmatpush3.msra.mxu1 %v428_v13 }
 0x156   : > { %v418_v20 = vpop.f32.mrf.mxu1 }
 0x157   : > { %v419_v21 = vadd.f32 %v418_v20, %v347_v19 }
 0x158   : > { %v742_v23 = vpop.f32.mrf.mxu1 }
 0x159   : > { %v427_v24 = vmul.f32 %v425_v22, %v419_v21 }
 0x15b   : > { %752 = vmatmul.mubr.msk.f32.vlgmr.msra.gmra.mxu1 %vm439_vm3, %v427_v24 }
 0x21b   : > { %v509_v29 = vpop.f32.mrf.mxu1 }
 0x21c   : > { %v510_v30 = vadd.f32 %v711_v28, %v509_v29 }
 0x21d   : > { %v753_v31 = vpop.f32.mrf.mxu1 }
 0x21e   : > { %v513_v32 = vmax.f32 %v510_v30, 0.0 }
 0x220   : > { %771 = vmatmul.mubr.msk.f32.vlgmr.msra.gmra.mxu0 %vm529_vm4, %v513_v32 }
 0x2e0   : > { %v599_v34 = vpop.f32.mrf.mxu0 }
 0x2e1   : > { %v600_v35 = vadd.f32 %v713_v33, %v599_v34 }
 0x2e2   : > { %v772_v36 = vpop.f32.mrf.mxu0 }
 0x2e3   : > { %603 = vst.msk [vmem:[%s322_s26] sm:$0xff] %vm439_vm3, %v600_v35 }
 0x2e4   : > { %829 = shalt.err (!%p826_p4)
}
 0x2e5   : > { %s830_s23 = scalar_lea.hbm %s1063_s17, 128  ;;  %s834_s25 = scalar_lea.hbm %s1107_s8, 256 }
 0x2e6   : > { %p831_p7 = scmp.ne.s32.totalorder %s1063_s17, %s830_s23  ;;  %p835_p10 = scmp.lt.s32.totalorder %s1063_s17, %s1107_s8 }
 0x2e7   : > { %p836_p11 = scmp.lt.s32.totalorder %s834_s25, %s830_s23 }
 0x2e8   : > { %p832_p8 = pnand %p831_p7, %p965_p5 }
 0x2e9   : > { %p837_p12 = por %p836_p11, %p835_p10 }
 0x2ea   : > { %p833_p9 = pneg %p832_p8 }
 0x2ec   : > { %p838_p13 = pnand %p837_p12, %p833_p9 }
 0x2ee   : > { %841 = shalt.err (!%p838_p13)
}
 0x2ef   : > { %773 = dma.vmem_to_hbm [thread:$0]  (%p965_p5), %s619_s10, 128, %s1063_s17, %s605_s18  }
 0x2f0 PF: > { %p779_p0 = scmp.ge.s32.totalorder %s876_s30, 2  ;;  %s630_s13 = sand.u32 1, %s864_s27  }
 0x2f1   : > { %s631_s19 = scalar_lea.sflag [#allocation3], %s630_s13 }
 0x2f2   : > { %p776_p1 = pnand %p779_p0, %p969_p6 }
 0x2f4   : > { %p777_p2 = pneg %p776_p1 }
 0x2f6   : > { %859 = dma.done.wait (%p777_p2), %s631_s19, 128  }
 0x2f7   : > { %861 = vsyncadd (%p777_p2), %s631_s19, 4294967168  ;;  %p18_p3 = scmp.ge.s32.totalorder %s952_s11, 4   ;;  %s1110_s27 = smov %s868_s28 }
 0x2f8   : > { %s1111_s28 = smov %s872_s29  ;;  %s1112_s29 = smov %s963_s14 }
 0x2f9   : > { %s1113_s30 = smov %s952_s11  ;;  %20 = sbr.rel (!%p18_p3) target bundleno = 3 (0x3), region = 93 }
 0x2fe   :  { %636 = vsyncpa [#allocation3], 1 }
 0x2ff   :  { %638 = vsyncpa [#allocation3 + $0x1], 1 }

</bundles_post_ra>
